<compile_context>
chip_gen: v5e
topology: v5e:2x2
jax: 0.10.0
libtpu: 0.0.40
codegen_flags: <defaults>
</compile_context>

<pallas_src>
import functools
import math

import jax
import jax.numpy as jnp
from jax.experimental import pallas as pl
from jax.experimental.pallas import tpu as pltpu


_MIB = 1024 * 1024
# Flipped to False at runtime if this Pallas build rejects pipeline_mode=pl.Buffered(1).
_SINGLE_BUFFER_INVARIANTS = True


def _auto_mxu_dtype():
    """bf16 MXU operands with f32 accumulation on every TPU generation (the v5e MXU takes
    bf16 natively; only its VPU lacks bf16, and recursion arithmetic here stays f32)."""
    try:
        platform = jax.devices()[0].platform
    except Exception:
        return jnp.float32
    return jnp.bfloat16 if platform == "tpu" else jnp.float32


def _vmem_limit_bytes():
    """Generation-aware scoped-VMEM limit: ~40 MiB on v7x (64 MiB physical VMEM),
    ~80 MiB on v5e/v6e (128 MiB physical)."""
    try:
        cap = pltpu.get_tpu_info().vmem_capacity_bytes
    except Exception:
        return 40 * _MIB
    return int(max(32 * _MIB, min(cap * 5 // 8, 96 * _MIB)))


def _invariant_spec(block_shape, index_map, single_buffer):
    """BlockSpec for a grid-invariant operand; single-buffered when supported."""
    if single_buffer:
        return pl.BlockSpec(block_shape, index_map, pipeline_mode=pl.Buffered(1))
    return pl.BlockSpec(block_shape, index_map)


def _pick_tb(batch, per_batch_bytes, unit, budget_bytes):
    """Batch tile TB.  Multi-step grids require TB % unit == 0 (keeps every block
    (8,128)-legal); prefer >= 2 grid steps (v7x has two TensorCores) and bound TB by the
    per-step VMEM working set.  Falls back to one step over the whole batch."""
    fit = max(1, int(budget_bytes) // max(int(per_batch_bytes), 1))
    if batch > unit:
        tb = min(fit, batch // 2)
        tb = (tb // unit) * unit
        if tb >= unit:
            return int(tb)
    # TODO(synk): if even one step over the whole batch overflows VMEM (huge B*N with tiny
    # C), switch the shared path to a 3-D node-major x block so TB < unit stays legal.
    return int(batch)


def _agcn_shared_kernel(sup_ref, x_ref, w_ref, b_ref, o_ref, *,
                        cheb_k, tb, n, c, o_pad, mxu_dtype):
    """Shared (2D) support.  x_ref is node-major: (N, TB*C) with columns (batch, chan), so
    each Chebyshev order is ONE dense (N,N)@(N,TB*C) MXU matmul (no broadcast of A)."""
    f32 = jnp.float32
    a_m = sup_ref[...].astype(mxu_dtype)                    # (N, N), cast once per step
    bias = b_ref[...].astype(f32)                           # (1, O_pad)

    # Chebyshev recursion on the signal: f32 carries, bf16 MXU operands, f32 accumulation.
    x2 = x_ref[...].astype(f32)                             # (N, TB*C)
    zs_m = [x2.astype(mxu_dtype)]                           # per-order MXU casts (cast once,
    if cheb_k >= 2:                                         #  reused by recursion & proj)
        z1 = jnp.dot(a_m, zs_m[0], preferred_element_type=f32)
        zs_m.append(z1.astype(mxu_dtype))
        z_pp, z_p = x2, z1
        for _ in range(2, cheb_k):
            # 2*A folded as a VPU scale of the dot result (no resident 2*A buffer).
            z_new = 2.0 * jnp.dot(a_m, zs_m[-1], preferred_element_type=f32) - z_pp
            zs_m.append(z_new.astype(mxu_dtype))
            z_pp, z_p = z_p, z_new

    # Fused projection: one (TB*N, K*C) @ (K*C, O_pad) matmul contracting over both the
    # Chebyshev order and the channel.  The node-major -> batch-major layout change is
    # TB*K static lane slices + concats (cheap next to the matmuls above).
    rows = []
    for b in range(tb):
        rows.append(jnp.concatenate([z[:, b * c:(b + 1) * c] for z in zs_m], axis=1))
    z_cat = jnp.concatenate(rows, axis=0) if tb > 1 else rows[0]      # (TB*N, K*C)
    out = jnp.dot(z_cat, w_ref[...].astype(mxu_dtype), preferred_element_type=f32) + bias
    o_ref[...] = out.reshape(tb, n, o_pad).astype(o_ref.dtype)


def _agcn_batched_kernel(sup_ref, x_ref, w_ref, b_ref, o_ref, *,
                         cheb_k, tb, n, c, o_pad, mxu_dtype):
    """Batched (3D, per-sample) support: batched MXU matmuls over the TB batch slice."""
    f32 = jnp.float32
    a_m = sup_ref[...].astype(mxu_dtype)                    # (TB, N, N), cast once per step
    bias = b_ref[...].astype(f32)                           # (1, O_pad)

    def bdot(z_m):                                          # (TB,N,N)@(TB,N,C), f32 acc
        return jnp.einsum("bnm,bmc->bnc", a_m, z_m, preferred_element_type=f32)

    x3 = x_ref[...].astype(f32)                             # (TB, N, C)
    zs_m = [x3.astype(mxu_dtype)]
    if cheb_k >= 2:
        z1 = bdot(zs_m[0])
        zs_m.append(z1.astype(mxu_dtype))
        z_pp, z_p = x3, z1
        for _ in range(2, cheb_k):
            z_new = 2.0 * bdot(zs_m[-1]) - z_pp              # 2*A as a VPU scale
            zs_m.append(z_new.astype(mxu_dtype))
            z_pp, z_p = z_p, z_new

    # Fused projection over (order, channel): (TB*N, K*C) @ (K*C, O_pad).
    z_cat = jnp.concatenate([z.reshape(tb * n, c) for z in zs_m], axis=1)
    out = jnp.dot(z_cat, w_ref[...].astype(mxu_dtype), preferred_element_type=f32) + bias
    o_ref[...] = out.reshape(tb, n, o_pad).astype(o_ref.dtype)


def agcn_forward(x, supports, weights, bias, cheb_k, mxu_dtype=None):
    """Pallas AGCN forward.  The PyTorch weights shape (cheb_k*dim_in, dim_out) only
    type-checks with a single support, so `supports` must have length 1."""
    assert len(supports) == 1, "weights shape (cheb_k*dim_in, dim_out) implies one support"
    assert cheb_k >= 2, "the module always emits [I, A, ...] => cheb_k >= 2"
    sup = supports[0]
    B, N, C = x.shape
    O = weights.shape[1]
    assert weights.shape[0] == cheb_k * C
    if mxu_dtype is None:
        mxu_dtype = _auto_mxu_dtype()

    f32b = 4
    x_isz = jnp.dtype(x.dtype).itemsize
    sup_isz = jnp.dtype(sup.dtype).itemsize
    mxu_isz = jnp.dtype(mxu_dtype).itemsize

    # Lane-dense output: pad C_out to a multiple of 128 (unmasked vst); sliced back after.
    O_pad = ((O + 127) // 128) * 128
    w_p = weights if O_pad == O else jnp.pad(weights, ((0, 0), (0, O_pad - O)))
    bias2d = (bias if O_pad == O else jnp.pad(bias, (0, O_pad - O))).reshape(1, O_pad)

    vmem_limit = _vmem_limit_bytes()
    batched = sup.ndim == 3

    # Approximate per-batch-element VMEM working set: double-buffered x/out blocks plus
    # resident f32 carries, per-order MXU casts, the fused-projection staging and acc.
    per_b = (2 * N * C * x_isz + 2 * N * O_pad * x_isz
             + N * C * (2 * f32b + (cheb_k + 1) * mxu_isz)
             + N * cheb_k * C * mxu_isz + N * O_pad * f32b)
    invariant = w_p.size * w_p.dtype.itemsize + bias2d.size * bias2d.dtype.itemsize
    if batched:
        per_b += 2 * N * N * sup_isz + N * N * mxu_isz
        unit = 1                           # per-sample support: any TB is block-legal
    else:
        invariant += N * N * (sup_isz + mxu_isz)
        unit = 128 // math.gcd(C, 128)     # x block (N, TB*C): lane dim must hit 128
    budget = max(vmem_limit - invariant - 4 * _MIB, per_b)

    TB = _pick_tb(B, per_b, unit, budget)
    B_pad = ((B + TB - 1) // TB) * TB
    grid = (B_pad // TB,)
    xb = x if B_pad == B else jnp.pad(x, ((0, B_pad - B), (0, 0), (0, 0)))

    if batched:
        sup_in = sup if B_pad == B else jnp.pad(sup, ((0, B_pad - B), (0, 0), (0, 0)))
        x_in = xb                                            # (B_pad, N, C), batch-major
        kernel = functools.partial(_agcn_batched_kernel, cheb_k=cheb_k, tb=TB,
                                   n=N, c=C, o_pad=O_pad, mxu_dtype=mxu_dtype)

        def sup_spec(single_buffer):
            del single_buffer                                # varies per grid step
            return pl.BlockSpec((TB, N, N), lambda b: (b, 0, 0))

        x_spec = pl.BlockSpec((TB, N, C), lambda b: (b, 0, 0))
    else:
        sup_in = sup
        # Node-major layout, done once in the wrapper: x_in[n, b*C + c] = x[b, n, c].
        x_in = jnp.transpose(xb, (1, 0, 2)).reshape(N, B_pad * C)
        kernel = functools.partial(_agcn_shared_kernel, cheb_k=cheb_k, tb=TB,
                                   n=N, c=C, o_pad=O_pad, mxu_dtype=mxu_dtype)

        def sup_spec(single_buffer):
            return _invariant_spec((N, N), lambda b: (0, 0), single_buffer)

        x_spec = pl.BlockSpec((N, TB * C), lambda b: (0, b))

    # Scheduler hint: per-operand itemsizes; invariant operands fetched once per call.
    sup_bytes = (sup_in.size if batched else sup.size) * sup_isz
    flops = (2 * B_pad * N * N * C * (cheb_k - 1)            # Chebyshev recursion matmuls
             + 2 * B_pad * N * cheb_k * C * O_pad)           # fused projection
    bytes_accessed = (x_in.size * x_isz + sup_bytes
                      + w_p.size * w_p.dtype.itemsize
                      + bias2d.size * bias2d.dtype.itemsize
                      + B_pad * N * O_pad * x_isz)
    cost = pl.CostEstimate(flops=int(flops), transcendentals=0,
                           bytes_accessed=int(bytes_accessed))

    def run(single_buffer):
        call = pl.pallas_call(
            kernel,
            out_shape=jax.ShapeDtypeStruct((B_pad, N, O_pad), x.dtype),
            grid_spec=pltpu.PrefetchScalarGridSpec(
                num_scalar_prefetch=0,
                grid=grid,
                in_specs=[
                    sup_spec(single_buffer),
                    x_spec,
                    _invariant_spec((cheb_k * C, O_pad), lambda b: (0, 0), single_buffer),
                    _invariant_spec((1, O_pad), lambda b: (0, 0), single_buffer),
                ],
                out_specs=pl.BlockSpec((TB, N, O_pad), lambda b: (b, 0, 0)),
            ),
            compiler_params=pltpu.CompilerParams(
                dimension_semantics=("parallel",),
                vmem_limit_bytes=vmem_limit,
            ),
            cost_estimate=cost,
        )
        return call(sup_in, x_in, w_p, bias2d)

    global _SINGLE_BUFFER_INVARIANTS
    try:
        out = run(_SINGLE_BUFFER_INVARIANTS)
    except Exception:
        # pipeline_mode=pl.Buffered(1) is the only optional feature used; retry without it
        # if this Pallas build rejects it (only reachable when called eagerly).
        if not _SINGLE_BUFFER_INVARIANTS:
            raise
        _SINGLE_BUFFER_INVARIANTS = False
        out = run(False)

    if B_pad != B or O_pad != O:
        out = out[:B, :, :O]
    return out


def agcn_reference(x, supports, weights, bias, cheb_k):
    """Pure-JAX f32 reference mirroring the PyTorch forward."""
    x_g = []
    for support in supports:
        if support.ndim == 2:
            ks = [jnp.eye(support.shape[0], dtype=support.dtype), support]
            for _ in range(2, cheb_k):
                ks.append(2.0 * support @ ks[-1] - ks[-2])
            for g in ks:
                x_g.append(jnp.einsum("nm,bmc->bnc", g, x))
        else:
            eye = jnp.broadcast_to(jnp.eye(support.shape[1], dtype=support.dtype),
                                   support.shape)
            ks = [eye, support]
            for _ in range(2, cheb_k):
                ks.append(2.0 * jnp.matmul(support, ks[-1]) - ks[-2])
            for g in ks:
                x_g.append(jnp.einsum("bnm,bmc->bnc", g, x))
    x_g = jnp.concatenate(x_g, axis=-1)
    return jnp.einsum("bni,io->bno", x_g, weights) + bias


if __name__ == "__main__":
    B, N, C_IN, C_OUT, CHEB_K = 2, 16, 4, 8, 3

    key = jax.random.PRNGKey(0)
    k_x, k_sup, k_sup3, k_w, k_b = jax.random.split(key, 5)

    x = jax.random.normal(k_x, (B, N, C_IN), dtype=jnp.float32)

    # Row-normalized random adjacency: 2D (shared) and 3D (per-sample) supports.
    a = jax.nn.softmax(jax.random.normal(k_sup, (N, N), dtype=jnp.float32), axis=-1)
    a3 = jax.nn.softmax(jax.random.normal(k_sup3, (B, N, N), dtype=jnp.float32), axis=-1)

    # Parameters: xavier_normal_-style weights; small non-zero bias to exercise the add.
    fan_in, fan_out = CHEB_K * C_IN, C_OUT
    std = math.sqrt(2.0 / (fan_in + fan_out))
    weights = std * jax.random.normal(k_w, (fan_in, fan_out), dtype=jnp.float32)
    bias = 0.1 * jax.random.normal(k_b, (fan_out,), dtype=jnp.float32)

    mxu_dtype = _auto_mxu_dtype()
    tol = 5e-2 if mxu_dtype == jnp.bfloat16 else 1e-4

    ok = True
    for sup in (a, a3):
        out = jax.block_until_ready(
            agcn_forward(x, [sup], weights, bias, CHEB_K, mxu_dtype=mxu_dtype))
        ref = agcn_reference(x, [sup], weights, bias, CHEB_K)
        ok = ok and (out.shape == ref.shape)
        ok = ok and bool(jnp.allclose(out, ref, atol=tol, rtol=tol))

    print("KERNEL_OK" if ok else "KERNEL_MISMATCH")
</pallas_src>

<mosaic_0001>
module attributes {stable_mosaic.version = 11 : i64} {
  func.func @_agcn_shared_kernel(%arg0: i32, %arg1: memref<16x16xf32, #tpu.memory_space<vmem>>, %arg2: memref<16x8xf32, #tpu.memory_space<vmem>>, %arg3: memref<12x128xf32, #tpu.memory_space<vmem>>, %arg4: memref<1x128xf32, #tpu.memory_space<vmem>>, %arg5: memref<2x16x128xf32, #tpu.memory_space<vmem>>) attributes {dimension_semantics = [#tpu.dimension_semantics<parallel>], iteration_bounds = array<i64: 1>, scalar_prefetch = 0 : i64, scratch_operands = 0 : i64, tpu.core_type = #tpu.core_type<tc>, window_params = [{pipeline_mode = #tpu.pipeline_mode<synchronous>, transform_indices = @transform_0, window_bounds = array<i64: 16, 16>}, {transform_indices = @transform_1, window_bounds = array<i64: 16, 8>}, {pipeline_mode = #tpu.pipeline_mode<synchronous>, transform_indices = @transform_2, window_bounds = array<i64: 12, 128>}, {pipeline_mode = #tpu.pipeline_mode<synchronous>, transform_indices = @transform_3, window_bounds = array<i64: 1, 128>}, {transform_indices = @transform_4, window_bounds = array<i64: 2, 16, 128>}]} {
    %c0 = arith.constant 0 : index
    %c0_0 = arith.constant 0 : index
    %0 = vector.load %arg1[%c0, %c0_0] : memref<16x16xf32, #tpu.memory_space<vmem>>, vector<16x16xf32>
    %c0_1 = arith.constant 0 : index
    %c0_2 = arith.constant 0 : index
    %1 = vector.load %arg4[%c0_1, %c0_2] : memref<1x128xf32, #tpu.memory_space<vmem>>, vector<1x128xf32>
    %c0_3 = arith.constant 0 : index
    %c0_4 = arith.constant 0 : index
    %2 = vector.load %arg2[%c0_3, %c0_4] : memref<16x8xf32, #tpu.memory_space<vmem>>, vector<16x8xf32>
    %cst = arith.constant dense<0.000000e+00> : vector<16x8xf32>
    %3 = tpu.matmul %0, %2, %cst {dimension_numbers = #tpu.dot_dimension_numbers<[1], [0], [0], [1], [0, 0, 1, 1], [], []>} : vector<16x16xf32>, vector<16x8xf32>, vector<16x8xf32> -> vector<16x8xf32>
    %cst_5 = arith.constant dense<0.000000e+00> : vector<16x8xf32>
    %4 = tpu.matmul %0, %3, %cst_5 {dimension_numbers = #tpu.dot_dimension_numbers<[1], [0], [0], [1], [0, 0, 1, 1], [], []>} : vector<16x16xf32>, vector<16x8xf32>, vector<16x8xf32> -> vector<16x8xf32>
    %cst_6 = arith.constant 2.000000e+00 : f32
    %5 = vector.broadcast %cst_6 : f32 to vector<16x8xf32>
    %6 = arith.mulf %5, %4 : vector<16x8xf32>
    %7 = arith.subf %6, %2 : vector<16x8xf32>
    %8 = vector.extract_strided_slice %2 {offsets = [0, 0], sizes = [16, 4], strides = [1, 1]} : vector<16x8xf32> to vector<16x4xf32>
    %9 = vector.extract_strided_slice %3 {offsets = [0, 0], sizes = [16, 4], strides = [1, 1]} : vector<16x8xf32> to vector<16x4xf32>
    %10 = vector.extract_strided_slice %7 {offsets = [0, 0], sizes = [16, 4], strides = [1, 1]} : vector<16x8xf32> to vector<16x4xf32>
    %11 = tpu.concatenate %8, %9, %10 in 1 : vector<16x4xf32>, vector<16x4xf32>, vector<16x4xf32> -> vector<16x12xf32>
    %12 = vector.extract_strided_slice %2 {offsets = [0, 4], sizes = [16, 4], strides = [1, 1]} : vector<16x8xf32> to vector<16x4xf32>
    %13 = vector.extract_strided_slice %3 {offsets = [0, 4], sizes = [16, 4], strides = [1, 1]} : vector<16x8xf32> to vector<16x4xf32>
    %14 = vector.extract_strided_slice %7 {offsets = [0, 4], sizes = [16, 4], strides = [1, 1]} : vector<16x8xf32> to vector<16x4xf32>
    %15 = tpu.concatenate %12, %13, %14 in 1 : vector<16x4xf32>, vector<16x4xf32>, vector<16x4xf32> -> vector<16x12xf32>
    %16 = tpu.concatenate %11, %15 in 0 : vector<16x12xf32>, vector<16x12xf32> -> vector<32x12xf32>
    %c0_7 = arith.constant 0 : index
    %c0_8 = arith.constant 0 : index
    %17 = vector.load %arg3[%c0_7, %c0_8] : memref<12x128xf32, #tpu.memory_space<vmem>>, vector<12x128xf32>
    %cst_9 = arith.constant dense<0.000000e+00> : vector<32x128xf32>
    %18 = tpu.matmul %16, %17, %cst_9 {dimension_numbers = #tpu.dot_dimension_numbers<[1], [0], [0], [1], [0, 0, 1, 1], [], []>} : vector<32x12xf32>, vector<12x128xf32>, vector<32x128xf32> -> vector<32x128xf32>
    %19 = vector.broadcast %1 : vector<1x128xf32> to vector<32x128xf32>
    %20 = arith.addf %18, %19 : vector<32x128xf32>
    %21 = vector.shape_cast %20 : vector<32x128xf32> to vector<2x16x128xf32>
    %c0_10 = arith.constant 0 : index
    %c0_11 = arith.constant 0 : index
    %c0_12 = arith.constant 0 : index
    %22 = vector.load %arg5[%c0_10, %c0_11, %c0_12] : memref<2x16x128xf32, #tpu.memory_space<vmem>>, vector<2x16x128xf32>
    tpu.vector_store %arg5[%c0_10, %c0_11, %c0_12], %21 {strides = array<i32>} : memref<2x16x128xf32, #tpu.memory_space<vmem>>, vector<2x16x128xf32>,
    return
  }
  func.func @transform_0(%arg0: i32) -> (i32, i32) {
    %c0_i32 = arith.constant 0 : i32
    %c0_i32_0 = arith.constant 0 : i32
    %c0_i32_1 = arith.constant 0 : i32
    return %c0_i32, %c0_i32_0 : i32, i32
  }
  func.func @transform_1(%arg0: i32) -> (i32, i32) {
    %c0_i32 = arith.constant 0 : i32
    %c0_i32_0 = arith.constant 0 : i32
    return %c0_i32, %arg0 : i32, i32
  }
  func.func @transform_2(%arg0: i32) -> (i32, i32) {
    %c0_i32 = arith.constant 0 : i32
    %c0_i32_0 = arith.constant 0 : i32
    %c0_i32_1 = arith.constant 0 : i32
    return %c0_i32, %c0_i32_0 : i32, i32
  }
  func.func @transform_3(%arg0: i32) -> (i32, i32) {
    %c0_i32 = arith.constant 0 : i32
    %c0_i32_0 = arith.constant 0 : i32
    %c0_i32_1 = arith.constant 0 : i32
    return %c0_i32, %c0_i32_0 : i32, i32
  }
  func.func @transform_4(%arg0: i32) -> (i32, i32, i32) {
    %c0_i32 = arith.constant 0 : i32
    %c0_i32_0 = arith.constant 0 : i32
    %c0_i32_1 = arith.constant 0 : i32
    return %arg0, %c0_i32, %c0_i32_0 : i32, i32, i32
  }
}

module attributes {stable_mosaic.version = 11 : i64} {
  func.func @_agcn_shared_kernel(%arg0: i32, %arg1: memref<16x16xf32, #tpu.memory_space<vmem>>, %arg2: memref<16x8xf32, #tpu.memory_space<vmem>>, %arg3: memref<12x128xf32, #tpu.memory_space<vmem>>, %arg4: memref<1x128xf32, #tpu.memory_space<vmem>>, %arg5: memref<2x16x128xf32, #tpu.memory_space<vmem>>) attributes {dimension_semantics = [#tpu.dimension_semantics<parallel>], iteration_bounds = array<i64: 1>, scalar_prefetch = 0 : i64, scratch_operands = 0 : i64, tpu.core_type = #tpu.core_type<tc>, window_params = [{pipeline_mode = #tpu.pipeline_mode<synchronous>, transform_indices = @transform_0, window_bounds = array<i64: 16, 16>}, {transform_indices = @transform_1, window_bounds = array<i64: 16, 8>}, {pipeline_mode = #tpu.pipeline_mode<synchronous>, transform_indices = @transform_2, window_bounds = array<i64: 12, 128>}, {pipeline_mode = #tpu.pipeline_mode<synchronous>, transform_indices = @transform_3, window_bounds = array<i64: 1, 128>}, {transform_indices = @transform_4, window_bounds = array<i64: 2, 16, 128>}]} {
    %c0 = arith.constant 0 : index
    %c0_0 = arith.constant 0 : index
    %0 = vector.load %arg1[%c0, %c0_0] : memref<16x16xf32, #tpu.memory_space<vmem>>, vector<16x16xf32>
    %c0_1 = arith.constant 0 : index
    %c0_2 = arith.constant 0 : index
    %1 = vector.load %arg4[%c0_1, %c0_2] : memref<1x128xf32, #tpu.memory_space<vmem>>, vector<1x128xf32>
    %c0_3 = arith.constant 0 : index
    %c0_4 = arith.constant 0 : index
    %2 = vector.load %arg2[%c0_3, %c0_4] : memref<16x8xf32, #tpu.memory_space<vmem>>, vector<16x8xf32>
    %cst = arith.constant dense<0.000000e+00> : vector<16x8xf32>
    %3 = tpu.matmul %0, %2, %cst {dimension_numbers = #tpu.dot_dimension_numbers<[1], [0], [0], [1], [0, 0, 1, 1], [], []>} : vector<16x16xf32>, vector<16x8xf32>, vector<16x8xf32> -> vector<16x8xf32>
    %cst_5 = arith.constant dense<0.000000e+00> : vector<16x8xf32>
    %4 = tpu.matmul %0, %3, %cst_5 {dimension_numbers = #tpu.dot_dimension_numbers<[1], [0], [0], [1], [0, 0, 1, 1], [], []>} : vector<16x16xf32>, vector<16x8xf32>, vector<16x8xf32> -> vector<16x8xf32>
    %cst_6 = arith.constant 2.000000e+00 : f32
    %5 = vector.broadcast %cst_6 : f32 to vector<16x8xf32>
    %6 = arith.mulf %5, %4 : vector<16x8xf32>
    %7 = arith.subf %6, %2 : vector<16x8xf32>
    %8 = vector.extract_strided_slice %2 {offsets = [0, 0], sizes = [16, 4], strides = [1, 1]} : vector<16x8xf32> to vector<16x4xf32>
    %9 = vector.extract_strided_slice %3 {offsets = [0, 0], sizes = [16, 4], strides = [1, 1]} : vector<16x8xf32> to vector<16x4xf32>
    %10 = vector.extract_strided_slice %7 {offsets = [0, 0], sizes = [16, 4], strides = [1, 1]} : vector<16x8xf32> to vector<16x4xf32>
    %11 = tpu.concatenate %8, %9, %10 in 1 : vector<16x4xf32>, vector<16x4xf32>, vector<16x4xf32> -> vector<16x12xf32>
    %12 = vector.extract_strided_slice %2 {offsets = [0, 4], sizes = [16, 4], strides = [1, 1]} : vector<16x8xf32> to vector<16x4xf32>
    %13 = vector.extract_strided_slice %3 {offsets = [0, 4], sizes = [16, 4], strides = [1, 1]} : vector<16x8xf32> to vector<16x4xf32>
    %14 = vector.extract_strided_slice %7 {offsets = [0, 4], sizes = [16, 4], strides = [1, 1]} : vector<16x8xf32> to vector<16x4xf32>
    %15 = tpu.concatenate %12, %13, %14 in 1 : vector<16x4xf32>, vector<16x4xf32>, vector<16x4xf32> -> vector<16x12xf32>
    %16 = tpu.concatenate %11, %15 in 0 : vector<16x12xf32>, vector<16x12xf32> -> vector<32x12xf32>
    %c0_7 = arith.constant 0 : index
    %c0_8 = arith.constant 0 : index
    %17 = vector.load %arg3[%c0_7, %c0_8] : memref<12x128xf32, #tpu.memory_space<vmem>>, vector<12x128xf32>
    %cst_9 = arith.constant dense<0.000000e+00> : vector<32x128xf32>
    %18 = tpu.matmul %16, %17, %cst_9 {dimension_numbers = #tpu.dot_dimension_numbers<[1], [0], [0], [1], [0, 0, 1, 1], [], []>} : vector<32x12xf32>, vector<12x128xf32>, vector<32x128xf32> -> vector<32x128xf32>
    %19 = vector.broadcast %1 : vector<1x128xf32> to vector<32x128xf32>
    %20 = arith.addf %18, %19 : vector<32x128xf32>
    %21 = vector.shape_cast %20 : vector<32x128xf32> to vector<2x16x128xf32>
    %c0_10 = arith.constant 0 : index
    %c0_11 = arith.constant 0 : index
    %c0_12 = arith.constant 0 : index
    %22 = vector.load %arg5[%c0_10, %c0_11, %c0_12] : memref<2x16x128xf32, #tpu.memory_space<vmem>>, vector<2x16x128xf32>
    tpu.vector_store %arg5[%c0_10, %c0_11, %c0_12], %21 {strides = array<i32>} : memref<2x16x128xf32, #tpu.memory_space<vmem>>, vector<2x16x128xf32>,
    return
  }
  func.func @transform_0(%arg0: i32) -> (i32, i32) {
    %c0_i32 = arith.constant 0 : i32
    %c0_i32_0 = arith.constant 0 : i32
    %c0_i32_1 = arith.constant 0 : i32
    return %c0_i32, %c0_i32_0 : i32, i32
  }
  func.func @transform_1(%arg0: i32) -> (i32, i32) {
    %c0_i32 = arith.constant 0 : i32
    %c0_i32_0 = arith.constant 0 : i32
    return %c0_i32, %arg0 : i32, i32
  }
  func.func @transform_2(%arg0: i32) -> (i32, i32) {
    %c0_i32 = arith.constant 0 : i32
    %c0_i32_0 = arith.constant 0 : i32
    %c0_i32_1 = arith.constant 0 : i32
    return %c0_i32, %c0_i32_0 : i32, i32
  }
  func.func @transform_3(%arg0: i32) -> (i32, i32) {
    %c0_i32 = arith.constant 0 : i32
    %c0_i32_0 = arith.constant 0 : i32
    %c0_i32_1 = arith.constant 0 : i32
    return %c0_i32, %c0_i32_0 : i32, i32
  }
  func.func @transform_4(%arg0: i32) -> (i32, i32, i32) {
    %c0_i32 = arith.constant 0 : i32
    %c0_i32_0 = arith.constant 0 : i32
    %c0_i32_1 = arith.constant 0 : i32
    return %arg0, %c0_i32, %c0_i32_0 : i32, i32, i32
  }
}

</mosaic_0001>

<bundles_post_ra>
// kernel: tpu_custom_call.1
= control target key start
LH: loop header
LB: loop body
LE: loop exit
PB: predicated region body
PF: predicated region fallthrough
CT: control target
= control target key end

     0   :  { %9 = vsyncpa [#allocation3], 0  ;;  %s356_s0 = inlined_call_operand.vmem [shape: f32[16,16], index: 0, kind: input, shape index: {}]   ;;  %s357_s1 = inlined_call_operand.vmem [shape: f32[16,8], index: 1, kind: input, shape index: {}]   ;;  %s358_s2 = inlined_call_operand.hbm [shape: f32[12,128], index: 2, kind: input, shape index: {}]   ;;  %s359_s3 = inlined_call_operand.vmem [shape: f32[1,128], index: 3, kind: input, shape index: {}]   ;;  %s360_s4 = inlined_call_operand.hbm [shape: f32[2,16,128], index: 4, kind: output, shape index: {}]  }
   0x1   :  { %10 = vsyncpa [#allocation4], 0  ;;  %s19_s17 = sshll.u32 %s358_s2, 4  ;;  %s280_s18 = smov [#allocation2]   ;;  %s20_s17 = int_to_ptr.hbm [resolvable:$true] %s19_s17 }
   0x2   :  { %s21_s19 = sshll.u32 %s280_s18, 4  ;;  %s281_s20 = smov 128   ;;  %s22_s19 = int_to_ptr.vmem [resolvable:$true] %s21_s19 }
   0x3   :  { %s282_s21 = smov 8  }
   0x4   :  { %27 = dma.hbm_to_vmem [thread:$0]  %s20_s17, 256, %s22_s19, [#allocation3], %s281_s20, %s281_s20, %s282_s21  }
   0x5   :  { %276 = dma.done.wait [#allocation3], 256  }
   0x6   :  { %277 = vsyncadd [#allocation3], 4294967040  ;;  %v38_v0 = vld [vmem:[%s357_s1 + $0x8] sm:$0xff]  ;;  %v37_v1 = vld [vmem:[%s357_s1] sm:$0xff]  ;;  %vm39_vm0 = vcmask 130048   ;;  %s283_s29 = smov 4  }
   0x7   :  { %60 = vmatpush.msra.mxu0 %v38_v0  ;;  %v34_v2 = vld [vmem:[%s356_s0] sm:$0xff]  ;;  %v35_v3 = vld [vmem:[%s356_s0 + $0x8] sm:$0xff]  ;;  %s284_s1 = smov 124   ;;  %vm154_vm1 = vcmask 1043456   ;;  %vm115_vm2 = vcmask 64512   ;;  %vm112_vm3 = vcmask 31744  }
   0x8   :  { %v137_v6 = vld [vmem:[#allocation2 + $0x8] sm:$0xf]  ;;  %v136_v13 = vld [vmem:[#allocation2] sm:$0xff]  ;;  %vm141_vm4 = vcmask 97280   ;;  %s285_s5 = smov [#allocation5]   ;;  %s197_s9 = sshll.u32 %s360_s4, 4  ;;  %s198_s9 = int_to_ptr.hbm [resolvable:$true] %s197_s9 }
   0x9   :  { %61 = vmatpush.msra.mxu0 %v37_v1  ;;  %214 = vmatpush.msk.msra.mxu2 %vm154_vm1, %v137_v6  ;;  %v227_v30 = vld [vmem:[%s359_s3] ss:$0 sm:$0xff]  ;;  %s195_s6 = sshll.u32 %s285_s5, 4  ;;  %s196_s6 = int_to_ptr.vmem [resolvable:$true] %s195_s6 }
   0xa   :  { %210 = vmatmul.msk.f32.vlgmr.msra.gmra.mxu0 %vm39_vm0, %v34_v2  ;;  %219 = vmatpush.msk.msra.mxu3 %vm154_vm1, %v137_v6 }
   0xb   :  { %173 = vmatpush.msra.mxu2 %v136_v13 }
   0xc   :  { %220 = vmatpush.msra.mxu3 %v136_v13 }
  0x12   :  { %211 = vmatmul.msk.f32.gmra.mxu0 %vm39_vm0, %v35_v3 }
  0x87   :  { %v63_v4 = vpop.f32.mrf.mxu0 }
  0x88   :  { %98 = vrot.lane.b32.xlu0 %v63_v4, %s283_s29 }
  0x8f   :  { %v66_v5 = vpop.f32.mrf.mxu0 }
  0x90   :  { %120 = vrot.lane.b32.xlu0 %v37_v1, %s284_s1  ;;  %100 = vrot.lane.b32.xlu2 %v66_v5, %s283_s29 }
  0x91   :  { %83 = vmatpush.msra.mxu1 %v66_v5 }
  0x93   :  { %84 = vmatpush.msra.mxu1 %v63_v4 }
  0x94   :  { %212 = vmatmul.msk.f32.vlgmr.msra.gmra.mxu1 %vm39_vm0, %v34_v2 }
  0x98   :  { %122 = vrot.lane.b32.xlu2 %v38_v0, %s284_s1 }
  0x9c   :  { %213 = vmatmul.msk.f32.gmra.mxu1 %vm39_vm0, %v35_v3 }
  0xea   :  { %v101_v19 = vpop.permute.xlu2 %100 }
  0xeb   :  { %v114_v20 = vsel %vm112_vm3, %v38_v0, %v101_v19 }
  0xf2   :  { %v123_v26 = vpop.permute.xlu2 %122 }
  0xf3   :  { %v133_v27 = vsel %vm112_vm3, %v123_v26, %v66_v5 }
  0xfa   :  { %v99_v14 = vpop.permute.xlu0 %98 }
  0xfb   :  { %v113_v15 = vsel %vm112_vm3, %v37_v1, %v99_v14 }
 0x102   :  { %v121_v16 = vpop.permute.xlu0 %120 }
 0x103   :  { %v132_v21 = vsel %vm112_vm3, %v121_v16, %v63_v4 }
 0x111   :  { %v86_v7 = vpop.f32.mrf.mxu1 }
 0x112   :  { %v92_v8 = vmul.f32 2.0, %v86_v7 }
 0x114   :  { %v94_v9 = vsub.f32 %v92_v8, %v37_v1 }
 0x116   :  { %106 = vrot.lane.b32.xlu1 %v94_v9, %s282_s21 }
 0x119   :  { %v89_v10 = vpop.f32.mrf.mxu1 }
 0x11a   :  { %v93_v11 = vmul.f32 2.0, %v89_v10 }
 0x11c   :  { %v95_v12 = vsub.f32 %v93_v11, %v38_v0 }
 0x11e   :  { %126 = vrot.lane.b32.xlu1 %v94_v9, %s283_s29  ;;  %108 = vrot.lane.b32.xlu0 %v95_v12, %s282_s21 }
 0x126   :  { %128 = vrot.lane.b32.xlu1 %v95_v12, %s283_s29 }
 0x188   :  { %v107_v17 = vpop.permute.xlu1 %106 }
 0x189   :  { %v116_v18 = vsel %vm115_vm2, %v113_v15, %v107_v17 }
 0x18a   :  { %215 = vmatmul.msk.f32.vlgmr.msra.gmra.mxu2 %vm141_vm4, %v116_v18 }
 0x190   :  { %v127_v22 = vpop.permute.xlu1 %126  ;;  %v109_v23 = vpop.permute.xlu0 %108 }
 0x191   :  { %v117_v24 = vsel %vm115_vm2, %v114_v20, %v109_v23  ;;  %v134_v25 = vsel %vm115_vm2, %v132_v21, %v127_v22 }
 0x192   :  { %216 = vmatmul.msk.f32.gmra.mxu2 %vm141_vm4, %v117_v24  ;;  %217 = vmatmul.msk.f32.vlgmr.msra.gmra.mxu3 %vm141_vm4, %v134_v25 }
 0x198   :  { %v129_v28 = vpop.permute.xlu1 %128 }
 0x199   :  { %v135_v29 = vsel %vm115_vm2, %v133_v27, %v129_v28 }
 0x19a   :  { %218 = vmatmul.msk.f32.gmra.mxu3 %vm141_vm4, %v135_v29 }
 0x20d   :  { %v175_v31 = vpop.f32.mrf.mxu2 }
 0x20e   :  { %v176_v32 = vadd.f32 %v227_v30, %v175_v31 }
 0x210   :  { %187 = vst [vmem:[#allocation5] sm:$0xff] %v176_v32 }
 0x215   :  { %v178_v33 = vpop.f32.mrf.mxu2  ;;  %v181_v34 = vpop.f32.mrf.mxu3 }
 0x216   :  { %v179_v35 = vadd.f32 %v227_v30, %v178_v33  ;;  %v182_v36 = vadd.f32 %v227_v30, %v181_v34 }
 0x218   :  { %188 = vst [vmem:[#allocation5 + $0x8] sm:$0xff] %v179_v35 }
 0x219   :  { %189 = vst [vmem:[#allocation5 + $0x10] sm:$0xff] %v182_v36 }
 0x21d   :  { %v184_v37 = vpop.f32.mrf.mxu3 }
 0x21e   :  { %v185_v38 = vadd.f32 %v227_v30, %v184_v37 }
 0x220   :  { %190 = vst [vmem:[#allocation5 + $0x18] sm:$0xff] %v185_v38 }
 0x221   :  { %203 = dma.vmem_to_hbm [thread:$0]  %s196_s6, 512, %s198_s9, [#allocation4], %s281_s20, %s281_s20, %s282_s21  }
 0x222   :  { %278 = dma.done.wait [#allocation4], 512  }
 0x223   :  { %279 = vsyncadd [#allocation4], 4294966784 }
 0x224   :  { %208 = vsyncpa [#allocation3], 1 }
 0x225   :  { %209 = vsyncpa [#allocation4], 1 }

// kernel: tpu_custom_call.1
= control target key start
LH: loop header
LB: loop body
LE: loop exit
PB: predicated region body
PF: predicated region fallthrough
CT: control target
= control target key end

     0   :  { %9 = vsyncpa [#allocation3], 0  ;;  %s356_s0 = inlined_call_operand.vmem [shape: f32[16,16], index: 0, kind: input, shape index: {}]   ;;  %s357_s1 = inlined_call_operand.vmem [shape: f32[16,8], index: 1, kind: input, shape index: {}]   ;;  %s358_s2 = inlined_call_operand.hbm [shape: f32[12,128], index: 2, kind: input, shape index: {}]   ;;  %s359_s3 = inlined_call_operand.vmem [shape: f32[1,128], index: 3, kind: input, shape index: {}]   ;;  %s360_s4 = inlined_call_operand.hbm [shape: f32[2,16,128], index: 4, kind: output, shape index: {}]  }
   0x1   :  { %10 = vsyncpa [#allocation4], 0  ;;  %s19_s17 = sshll.u32 %s358_s2, 4  ;;  %s280_s18 = smov [#allocation2]   ;;  %s20_s17 = int_to_ptr.hbm [resolvable:$true] %s19_s17 }
   0x2   :  { %s21_s19 = sshll.u32 %s280_s18, 4  ;;  %s281_s20 = smov 128   ;;  %s22_s19 = int_to_ptr.vmem [resolvable:$true] %s21_s19 }
   0x3   :  { %s282_s21 = smov 8  }
   0x4   :  { %27 = dma.hbm_to_vmem [thread:$0]  %s20_s17, 256, %s22_s19, [#allocation3], %s281_s20, %s281_s20, %s282_s21  }
   0x5   :  { %276 = dma.done.wait [#allocation3], 256  }
   0x6   :  { %277 = vsyncadd [#allocation3], 4294967040  ;;  %v38_v0 = vld [vmem:[%s357_s1 + $0x8] sm:$0xff]  ;;  %v37_v1 = vld [vmem:[%s357_s1] sm:$0xff]  ;;  %vm39_vm0 = vcmask 130048   ;;  %s283_s29 = smov 4  }
   0x7   :  { %60 = vmatpush.msra.mxu0 %v38_v0  ;;  %v34_v2 = vld [vmem:[%s356_s0] sm:$0xff]  ;;  %v35_v3 = vld [vmem:[%s356_s0 + $0x8] sm:$0xff]  ;;  %s284_s1 = smov 124   ;;  %vm154_vm1 = vcmask 1043456   ;;  %vm115_vm2 = vcmask 64512   ;;  %vm112_vm3 = vcmask 31744  }
   0x8   :  { %v137_v6 = vld [vmem:[#allocation2 + $0x8] sm:$0xf]  ;;  %v136_v13 = vld [vmem:[#allocation2] sm:$0xff]  ;;  %vm141_vm4 = vcmask 97280   ;;  %s285_s5 = smov [#allocation5]   ;;  %s197_s9 = sshll.u32 %s360_s4, 4  ;;  %s198_s9 = int_to_ptr.hbm [resolvable:$true] %s197_s9 }
   0x9   :  { %61 = vmatpush.msra.mxu0 %v37_v1  ;;  %214 = vmatpush.msk.msra.mxu2 %vm154_vm1, %v137_v6  ;;  %v227_v30 = vld [vmem:[%s359_s3] ss:$0 sm:$0xff]  ;;  %s195_s6 = sshll.u32 %s285_s5, 4  ;;  %s196_s6 = int_to_ptr.vmem [resolvable:$true] %s195_s6 }
   0xa   :  { %210 = vmatmul.msk.f32.vlgmr.msra.gmra.mxu0 %vm39_vm0, %v34_v2  ;;  %219 = vmatpush.msk.msra.mxu3 %vm154_vm1, %v137_v6 }
   0xb   :  { %173 = vmatpush.msra.mxu2 %v136_v13 }
   0xc   :  { %220 = vmatpush.msra.mxu3 %v136_v13 }
  0x12   :  { %211 = vmatmul.msk.f32.gmra.mxu0 %vm39_vm0, %v35_v3 }
  0x87   :  { %v63_v4 = vpop.f32.mrf.mxu0 }
  0x88   :  { %98 = vrot.lane.b32.xlu0 %v63_v4, %s283_s29 }
  0x8f   :  { %v66_v5 = vpop.f32.mrf.mxu0 }
  0x90   :  { %120 = vrot.lane.b32.xlu0 %v37_v1, %s284_s1  ;;  %100 = vrot.lane.b32.xlu2 %v66_v5, %s283_s29 }
  0x91   :  { %83 = vmatpush.msra.mxu1 %v66_v5 }
  0x93   :  { %84 = vmatpush.msra.mxu1 %v63_v4 }
  0x94   :  { %212 = vmatmul.msk.f32.vlgmr.msra.gmra.mxu1 %vm39_vm0, %v34_v2 }
  0x98   :  { %122 = vrot.lane.b32.xlu2 %v38_v0, %s284_s1 }
  0x9c   :  { %213 = vmatmul.msk.f32.gmra.mxu1 %vm39_vm0, %v35_v3 }
  0xea   :  { %v101_v19 = vpop.permute.xlu2 %100 }
  0xeb   :  { %v114_v20 = vsel %vm112_vm3, %v38_v0, %v101_v19 }
  0xf2   :  { %v123_v26 = vpop.permute.xlu2 %122 }
  0xf3   :  { %v133_v27 = vsel %vm112_vm3, %v123_v26, %v66_v5 }
  0xfa   :  { %v99_v14 = vpop.permute.xlu0 %98 }
  0xfb   :  { %v113_v15 = vsel %vm112_vm3, %v37_v1, %v99_v14 }
 0x102   :  { %v121_v16 = vpop.permute.xlu0 %120 }
 0x103   :  { %v132_v21 = vsel %vm112_vm3, %v121_v16, %v63_v4 }
 0x111   :  { %v86_v7 = vpop.f32.mrf.mxu1 }
 0x112   :  { %v92_v8 = vmul.f32 2.0, %v86_v7 }
 0x114   :  { %v94_v9 = vsub.f32 %v92_v8, %v37_v1 }
 0x116   :  { %106 = vrot.lane.b32.xlu1 %v94_v9, %s282_s21 }
 0x119   :  { %v89_v10 = vpop.f32.mrf.mxu1 }
 0x11a   :  { %v93_v11 = vmul.f32 2.0, %v89_v10 }
 0x11c   :  { %v95_v12 = vsub.f32 %v93_v11, %v38_v0 }
 0x11e   :  { %126 = vrot.lane.b32.xlu1 %v94_v9, %s283_s29  ;;  %108 = vrot.lane.b32.xlu0 %v95_v12, %s282_s21 }
 0x126   :  { %128 = vrot.lane.b32.xlu1 %v95_v12, %s283_s29 }
 0x188   :  { %v107_v17 = vpop.permute.xlu1 %106 }
 0x189   :  { %v116_v18 = vsel %vm115_vm2, %v113_v15, %v107_v17 }
 0x18a   :  { %215 = vmatmul.msk.f32.vlgmr.msra.gmra.mxu2 %vm141_vm4, %v116_v18 }
 0x190   :  { %v127_v22 = vpop.permute.xlu1 %126  ;;  %v109_v23 = vpop.permute.xlu0 %108 }
 0x191   :  { %v117_v24 = vsel %vm115_vm2, %v114_v20, %v109_v23  ;;  %v134_v25 = vsel %vm115_vm2, %v132_v21, %v127_v22 }
 0x192   :  { %216 = vmatmul.msk.f32.gmra.mxu2 %vm141_vm4, %v117_v24  ;;  %217 = vmatmul.msk.f32.vlgmr.msra.gmra.mxu3 %vm141_vm4, %v134_v25 }
 0x198   :  { %v129_v28 = vpop.permute.xlu1 %128 }
 0x199   :  { %v135_v29 = vsel %vm115_vm2, %v133_v27, %v129_v28 }
 0x19a   :  { %218 = vmatmul.msk.f32.gmra.mxu3 %vm141_vm4, %v135_v29 }
 0x20d   :  { %v175_v31 = vpop.f32.mrf.mxu2 }
 0x20e   :  { %v176_v32 = vadd.f32 %v227_v30, %v175_v31 }
 0x210   :  { %187 = vst [vmem:[#allocation5] sm:$0xff] %v176_v32 }
 0x215   :  { %v178_v33 = vpop.f32.mrf.mxu2  ;;  %v181_v34 = vpop.f32.mrf.mxu3 }
 0x216   :  { %v179_v35 = vadd.f32 %v227_v30, %v178_v33  ;;  %v182_v36 = vadd.f32 %v227_v30, %v181_v34 }
 0x218   :  { %188 = vst [vmem:[#allocation5 + $0x8] sm:$0xff] %v179_v35 }
 0x219   :  { %189 = vst [vmem:[#allocation5 + $0x10] sm:$0xff] %v182_v36 }
 0x21d   :  { %v184_v37 = vpop.f32.mrf.mxu3 }
 0x21e   :  { %v185_v38 = vadd.f32 %v227_v30, %v184_v37 }
 0x220   :  { %190 = vst [vmem:[#allocation5 + $0x18] sm:$0xff] %v185_v38 }
 0x221   :  { %203 = dma.vmem_to_hbm [thread:$0]  %s196_s6, 512, %s198_s9, [#allocation4], %s281_s20, %s281_s20, %s282_s21  }
 0x222   :  { %278 = dma.done.wait [#allocation4], 512  }
 0x223   :  { %279 = vsyncadd [#allocation4], 4294966784 }
 0x224   :  { %208 = vsyncpa [#allocation3], 1 }
 0x225   :  { %209 = vsyncpa [#allocation4], 1 }

</bundles_post_ra>
